<compile_context>
chip_gen: v6e
topology: v6e:2x2x1
jax: 0.10.0
libtpu: 0.0.40
codegen_flags: <defaults>
</compile_context>

<pallas_src>
import functools

import jax
import jax.numpy as jnp
from jax.experimental import pallas as pl
from jax.experimental.pallas import tpu as pltpu


def _round_up(x, m):
    return ((x + m - 1) // m) * m


def _batch_tiling(B):
    """Pad batch to a sublane-friendly size and pick a batch tile.

    - B <= 128: single tile (pad to multiple of 8 sublanes).
    - 128 < B <= 256: TB=128 so the grid has >= 2 steps (both v7x TCs busy).
    - B > 256: TB=256 to feed the 256-wide MXU on v6e/v7x and amortize the
      ~0.35us per-step overhead (still fine on v5e's 128-wide MXU).
    """
    if B <= 128:
        BP = _round_up(max(B, 8), 8)
        return BP, BP
    TB = 128 if B <= 256 else 256
    BP = _round_up(B, TB)
    return BP, TB


_ON_TPU = jax.default_backend() == "tpu"
_SINGLE_BUFFER_WEIGHTS = _ON_TPU and hasattr(pl, "Buffered")

_COMPILER_PARAMS = pltpu.CompilerParams(
    dimension_semantics=("parallel",),      # batch grid axis -> 2 TCs on v7x
    vmem_limit_bytes=32 * 1024 * 1024,      # load-bearing on v5e (16 MiB default)
)


def _weight_spec(shape):
    """Full-extent, constant-index (VMEM-resident) weight block.

    Single-buffered on real TPUs: the block index never changes, so default
    double-buffering would only waste VMEM (matters at real D/hidden sizes,
    especially on v7x's 64 MiB VMEM).
    """
    idx = lambda i: (0, 0)
    if _SINGLE_BUFFER_WEIGHTS:
        return pl.BlockSpec(shape, idx, pipeline_mode=pl.Buffered(1))
    return pl.BlockSpec(shape, idx)


# ----------------------------- kernel math -----------------------------------
# bf16 matmul inputs, f32 MXU accumulation; elementwise math in f32.

def _encode_math(x_bf16, we1, be1, we2, be2):
    h = jnp.dot(x_bf16, we1, preferred_element_type=jnp.float32) + be1
    h = jnp.maximum(h, 0.0)
    # stats = [ mu (lanes 0:SP) | logvar (lanes SP:2*SP) ], lane-dense.
    return jnp.dot(h.astype(jnp.bfloat16), we2,
                   preferred_element_type=jnp.float32) + be2


def _decode_math(z, wd1, bd1, wd2, bd2):
    h = jnp.dot(z.astype(jnp.bfloat16), wd1,
                preferred_element_type=jnp.float32) + bd1
    h = jnp.maximum(h, 0.0)
    logits = jnp.dot(h.astype(jnp.bfloat16), wd2,
                     preferred_element_type=jnp.float32) + bd2
    return jax.nn.sigmoid(logits)           # stable logistic, f32


# ------------------------------ kernels --------------------------------------

def _vae_forward_kernel(x_ref, eps_ref,
                        we1_ref, be1_ref, we2_ref, be2_ref,
                        wd1_ref, bd1_ref, wd2_ref, bd2_ref,
                        recon_ref, stats_ref, *, stat_half):
    """Whole VAE forward fused into one kernel (weights resident in VMEM)."""
    stats = _encode_math(x_ref[...], we1_ref[...], be1_ref[...],
                         we2_ref[...], be2_ref[...])
    stats_ref[...] = stats                       # single packed [mu|logvar] DMA
    mu = stats[:, :stat_half]
    logvar = stats[:, stat_half:]
    # Reparameterize with host-supplied exact N(0,1) noise (tiny input stream).
    z = mu + eps_ref[...] * jnp.exp(0.5 * logvar)
    recon_ref[...] = _decode_math(z, wd1_ref[...], bd1_ref[...],
                                  wd2_ref[...], bd2_ref[...])


def _encoder_kernel(x_ref, we1_ref, be1_ref, we2_ref, be2_ref, stats_ref):
    stats_ref[...] = _encode_math(x_ref[...], we1_ref[...], be1_ref[...],
                                  we2_ref[...], be2_ref[...])


def _decoder_kernel(z_ref, wd1_ref, bd1_ref, wd2_ref, bd2_ref, recon_ref):
    recon_ref[...] = _decode_math(z_ref[...], wd1_ref[...], bd1_ref[...],
                                  wd2_ref[...], bd2_ref[...])


# ------------------------- VAE module -----------------------------------------

class VanillaVAEPallas:
    """Concrete realization of the abstract BaseVAE interface
    (encode / decode / sample / generate / forward).

    forward(x) -> [recon, x, mu, logvar]   (standard vanilla-VAE convention)
    """

    def __init__(self, in_channels, img_size, hidden_dim, latent_dim, key):
        self.C, self.H, self.W = in_channels, img_size, img_size
        self.D = in_channels * img_size * img_size
        self.hidden = hidden_dim
        self.latent = latent_dim
        # HP: hidden padded to 128 lanes (lane-dense matmuls / stores).
        # SP: per-stat padding; mu lives in lanes [0:SP), logvar in [SP:2*SP),
        #     2*SP is always a multiple of 128 -> lane-dense stats output.
        self.HP = _round_up(hidden_dim, 128)
        self.SP = _round_up(latent_dim, 64)
        ks = jax.random.split(key, 4)

        def init(k, shape, fan_in):
            return jax.random.normal(k, shape, jnp.float32) / jnp.sqrt(fan_in)

        D, HP, SP, Hd, Ld = self.D, self.HP, self.SP, hidden_dim, latent_dim

        # Encoder layer 1: (D, hidden) -> (D, HP), stored bf16.
        we1 = init(ks[0], (D, Hd), D)
        self.We1p = (jnp.zeros((D, HP), jnp.float32)
                     .at[:, :Hd].set(we1).astype(jnp.bfloat16))
        self.be1p = jnp.zeros((1, HP), jnp.float32)

        # Encoder layer 2: mu columns -> [0:Ld), logvar columns -> [SP:SP+Ld).
        we2 = init(ks[1], (Hd, 2 * Ld), Hd)
        we2p = jnp.zeros((HP, 2 * SP), jnp.float32)
        we2p = we2p.at[:Hd, :Ld].set(we2[:, :Ld])
        we2p = we2p.at[:Hd, SP:SP + Ld].set(we2[:, Ld:])
        self.We2p = we2p.astype(jnp.bfloat16)
        self.be2p = jnp.zeros((1, 2 * SP), jnp.float32)

        # Decoder layer 1: zero rows for padded latent lanes, so padded
        # (noise-carrying) z lanes never influence the reconstruction.
        wd1 = init(ks[2], (Ld, Hd), Ld)
        self.Wd1p = (jnp.zeros((SP, HP), jnp.float32)
                     .at[:Ld, :Hd].set(wd1).astype(jnp.bfloat16))
        self.bd1p = jnp.zeros((1, HP), jnp.float32)

        # Decoder layer 2.
        wd2 = init(ks[3], (Hd, D), Hd)
        self.Wd2p = (jnp.zeros((HP, D), jnp.float32)
                     .at[:Hd, :].set(wd2).astype(jnp.bfloat16))
        self.bd2p = jnp.zeros((1, D), jnp.float32)

        self._eps_key = jax.random.fold_in(key, 0xE95)

    # ---- internal fused forward call ----
    def _forward_padded(self, x_pad, eps_pad, TB):
        BP, D = x_pad.shape
        SP, HP = self.SP, self.HP
        batch = lambda i: (i, 0)
        return pl.pallas_call(
            functools.partial(_vae_forward_kernel, stat_half=SP),
            out_shape=(
                jax.ShapeDtypeStruct((BP, D), jnp.float32),       # recon
                jax.ShapeDtypeStruct((BP, 2 * SP), jnp.float32),  # [mu|logvar]
            ),
            grid=(BP // TB,),
            in_specs=[
                pl.BlockSpec((TB, D), batch),        # x (bf16)
                pl.BlockSpec((TB, SP), batch),       # eps (f32)
                _weight_spec((D, HP)),
                _weight_spec((1, HP)),
                _weight_spec((HP, 2 * SP)),
                _weight_spec((1, 2 * SP)),
                _weight_spec((SP, HP)),
                _weight_spec((1, HP)),
                _weight_spec((HP, D)),
                _weight_spec((1, D)),
            ],
            out_specs=(
                pl.BlockSpec((TB, D), batch),
                pl.BlockSpec((TB, 2 * SP), batch),
            ),
            compiler_params=_COMPILER_PARAMS,
        )(x_pad, eps_pad, self.We1p, self.be1p, self.We2p, self.be2p,
          self.Wd1p, self.bd1p, self.Wd2p, self.bd2p)

    # ---- wrapper helpers (cast folded into the pad copy; skipped if aligned) -
    def _prep_x(self, x, BP):
        B = x.shape[0]
        xf = jnp.asarray(x).reshape(B, self.D).astype(jnp.bfloat16)
        return xf if BP == B else jnp.pad(xf, ((0, BP - B), (0, 0)))

    # ---- BaseVAE interface ----
    def encode(self, x0):
        B = x0.shape[0]
        BP, TB = _batch_tiling(B)
        x_pad = self._prep_x(x0, BP)
        D, HP, SP = self.D, self.HP, self.SP
        batch = lambda i: (i, 0)
        stats_p = pl.pallas_call(
            _encoder_kernel,
            out_shape=jax.ShapeDtypeStruct((BP, 2 * SP), jnp.float32),
            grid=(BP // TB,),
            in_specs=[
                pl.BlockSpec((TB, D), batch),
                _weight_spec((D, HP)),
                _weight_spec((1, HP)),
                _weight_spec((HP, 2 * SP)),
                _weight_spec((1, 2 * SP)),
            ],
            out_specs=pl.BlockSpec((TB, 2 * SP), batch),
            compiler_params=_COMPILER_PARAMS,
        )(x_pad, self.We1p, self.be1p, self.We2p, self.be2p)
        mu = stats_p[:B, :self.latent]
        logvar = stats_p[:B, SP:SP + self.latent]
        return [mu, logvar]

    def decode(self, z):
        z = jnp.asarray(z, jnp.float32)
        B = z.shape[0]
        BP, TB = _batch_tiling(B)
        z_pad = jnp.pad(z, ((0, BP - B), (0, self.SP - self.latent)))
        D, HP, SP = self.D, self.HP, self.SP
        batch = lambda i: (i, 0)
        recon_p = pl.pallas_call(
            _decoder_kernel,
            out_shape=jax.ShapeDtypeStruct((BP, D), jnp.float32),
            grid=(BP // TB,),
            in_specs=[
                pl.BlockSpec((TB, SP), batch),
                _weight_spec((SP, HP)),
                _weight_spec((1, HP)),
                _weight_spec((HP, D)),
                _weight_spec((1, D)),
            ],
            out_specs=pl.BlockSpec((TB, D), batch),
            compiler_params=_COMPILER_PARAMS,
        )(z_pad, self.Wd1p, self.bd1p, self.Wd2p, self.bd2p)
        recon_p = recon_p if BP == B else recon_p[:B]
        return recon_p.reshape(B, self.C, self.H, self.W)

    def sample(self, batch_size, current_device=None, key=None, **kwargs):
        if key is None:
            self._eps_key, key = jax.random.split(self._eps_key)
        z = jax.random.normal(key, (batch_size, self.latent), jnp.float32)
        return self.decode(z)

    def generate(self, x, **kwargs):
        return self.forward(x)[0]

    def forward(self, x, key=None, eps=None):
        B = x.shape[0]
        BP, TB = _batch_tiling(B)
        if eps is None:
            if key is None:       # fresh noise every call
                self._eps_key, key = jax.random.split(self._eps_key)
            eps_pad = jax.random.normal(key, (BP, self.SP), jnp.float32)
        else:                     # caller-supplied (B, latent) noise
            eps = jnp.asarray(eps, jnp.float32)
            eps_pad = jnp.pad(eps, ((0, BP - B), (0, self.SP - self.latent)))
        x_pad = self._prep_x(x, BP)
        recon_p, stats_p = self._forward_padded(x_pad, eps_pad, TB)
        recon_p = recon_p if BP == B else recon_p[:B]
        recon = recon_p.reshape(B, self.C, self.H, self.W)
        mu = stats_p[:B, :self.latent]
        logvar = stats_p[:B, self.SP:self.SP + self.latent]
        return [recon, x, mu, logvar]

    # TODO(synk): loss_function / train (DataLoader + Optimizer loop) are
    # host-side training logic with no Pallas-kernel equivalent; omitted.


# ------------------------- reference (pure jnp, same math) --------------------

def _reference_forward(vae, x, eps):
    B = x.shape[0]
    xb = jnp.asarray(x).reshape(B, vae.D).astype(jnp.bfloat16)
    stats = _encode_math(xb, vae.We1p, vae.be1p, vae.We2p, vae.be2p)
    mu, logvar = stats[:, :vae.SP], stats[:, vae.SP:]
    eps_p = jnp.pad(jnp.asarray(eps, jnp.float32),
                    ((0, 0), (0, vae.SP - vae.latent)))
    z = mu + eps_p * jnp.exp(0.5 * logvar)
    recon = _decode_math(z, vae.Wd1p, vae.bd1p, vae.Wd2p, vae.bd2p)
    return (recon.reshape(B, vae.C, vae.H, vae.W),
            mu[:, :vae.latent], logvar[:, :vae.latent])


# ------------------------- main ------------------------------------------------

if __name__ == "__main__":
    key = jax.random.PRNGKey(0)
    kx, kp, kf = jax.random.split(key, 3)

    B, C, H, HID, LAT = 2, 4, 16, 32, 16
    x = jax.random.normal(kx, (B, C, H, H), jnp.float32)

    vae = VanillaVAEPallas(in_channels=C, img_size=H,
                           hidden_dim=HID, latent_dim=LAT, key=kp)

    # Fixed eps so the fused kernel can be checked against a pure-JAX reference.
    eps = jax.random.normal(kf, (B, LAT), jnp.float32)
    recon, x_out, mu, logvar = vae.forward(x, eps=eps)
    jax.block_until_ready((recon, x_out, mu, logvar))

    assert recon.shape == (B, C, H, H) and recon.dtype == jnp.float32
    assert mu.shape == (B, LAT) and logvar.shape == (B, LAT)
    assert bool(jnp.all(jnp.isfinite(recon)))
    assert bool(jnp.all(jnp.isfinite(mu))) and bool(jnp.all(jnp.isfinite(logvar)))

    recon_r, mu_r, logvar_r = _reference_forward(vae, x, eps)
    assert bool(jnp.allclose(recon, recon_r, rtol=2e-2, atol=2e-2))
    assert bool(jnp.allclose(mu, mu_r, rtol=2e-2, atol=2e-2))
    assert bool(jnp.allclose(logvar, logvar_r, rtol=2e-2, atol=2e-2))

    # Exercise the remaining BaseVAE entry points (encode / decode / sample).
    mu2, logvar2 = vae.encode(x)
    dec = vae.decode(mu2)
    samp = vae.sample(2, key=jax.random.PRNGKey(1))
    jax.block_until_ready((mu2, logvar2, dec, samp))
    assert mu2.shape == (B, LAT) and logvar2.shape == (B, LAT)
    assert dec.shape == (B, C, H, H) and samp.shape == (2, C, H, H)

    # Fresh-noise path (no eps / key supplied) also runs.
    recon2 = vae.forward(x)[0]
    jax.block_until_ready(recon2)
    assert bool(jnp.all(jnp.isfinite(recon2)))

    print("KERNEL_OK")
</pallas_src>

<mosaic_0001>
module attributes {stable_mosaic.version = 11 : i64} {
  func.func @_vae_forward_kernel(%arg0: i32, %arg1: memref<8x1024xbf16, #tpu.memory_space<vmem>>, %arg2: memref<8x64xf32, #tpu.memory_space<vmem>>, %arg3: memref<1024x128xbf16, #tpu.memory_space<vmem>>, %arg4: memref<1x128xf32, #tpu.memory_space<vmem>>, %arg5: memref<128x128xbf16, #tpu.memory_space<vmem>>, %arg6: memref<1x128xf32, #tpu.memory_space<vmem>>, %arg7: memref<64x128xbf16, #tpu.memory_space<vmem>>, %arg8: memref<1x128xf32, #tpu.memory_space<vmem>>, %arg9: memref<128x1024xbf16, #tpu.memory_space<vmem>>, %arg10: memref<1x1024xf32, #tpu.memory_space<vmem>>, %arg11: memref<8x1024xf32, #tpu.memory_space<vmem>>, %arg12: memref<8x128xf32, #tpu.memory_space<vmem>>) attributes {dimension_semantics = [#tpu.dimension_semantics<parallel>], iteration_bounds = array<i64: 1>, scalar_prefetch = 0 : i64, scratch_operands = 0 : i64, tpu.core_type = #tpu.core_type<tc>, window_params = [{transform_indices = @transform_0, window_bounds = array<i64: 8, 1024>}, {transform_indices = @transform_1, window_bounds = array<i64: 8, 64>}, {pipeline_mode = #tpu.pipeline_mode<synchronous>, transform_indices = @transform_2, window_bounds = array<i64: 1024, 128>}, {pipeline_mode = #tpu.pipeline_mode<synchronous>, transform_indices = @transform_3, window_bounds = array<i64: 1, 128>}, {pipeline_mode = #tpu.pipeline_mode<synchronous>, transform_indices = @transform_4, window_bounds = array<i64: 128, 128>}, {pipeline_mode = #tpu.pipeline_mode<synchronous>, transform_indices = @transform_5, window_bounds = array<i64: 1, 128>}, {pipeline_mode = #tpu.pipeline_mode<synchronous>, transform_indices = @transform_6, window_bounds = array<i64: 64, 128>}, {pipeline_mode = #tpu.pipeline_mode<synchronous>, transform_indices = @transform_7, window_bounds = array<i64: 1, 128>}, {pipeline_mode = #tpu.pipeline_mode<synchronous>, transform_indices = @transform_8, window_bounds = array<i64: 128, 1024>}, {pipeline_mode = #tpu.pipeline_mode<synchronous>, transform_indices = @transform_9, window_bounds = array<i64: 1, 1024>}, {transform_indices = @transform_10, window_bounds = array<i64: 8, 1024>}, {transform_indices = @transform_11, window_bounds = array<i64: 8, 128>}]} {
    %c0 = arith.constant 0 : index
    %c0_0 = arith.constant 0 : index
    %0 = vector.load %arg1[%c0, %c0_0] : memref<8x1024xbf16, #tpu.memory_space<vmem>>, vector<8x1024xbf16>
    %c0_1 = arith.constant 0 : index
    %c0_2 = arith.constant 0 : index
    %1 = vector.load %arg3[%c0_1, %c0_2] : memref<1024x128xbf16, #tpu.memory_space<vmem>>, vector<1024x128xbf16>
    %c0_3 = arith.constant 0 : index
    %c0_4 = arith.constant 0 : index
    %2 = vector.load %arg4[%c0_3, %c0_4] : memref<1x128xf32, #tpu.memory_space<vmem>>, vector<1x128xf32>
    %c0_5 = arith.constant 0 : index
    %c0_6 = arith.constant 0 : index
    %3 = vector.load %arg5[%c0_5, %c0_6] : memref<128x128xbf16, #tpu.memory_space<vmem>>, vector<128x128xbf16>
    %c0_7 = arith.constant 0 : index
    %c0_8 = arith.constant 0 : index
    %4 = vector.load %arg6[%c0_7, %c0_8] : memref<1x128xf32, #tpu.memory_space<vmem>>, vector<1x128xf32>
    %cst = arith.constant dense<0.000000e+00> : vector<8x128xf32>
    %5 = tpu.matmul %0, %1, %cst {dimension_numbers = #tpu.dot_dimension_numbers<[1], [0], [0], [1], [0, 0, 1, 1], [], []>} : vector<8x1024xbf16>, vector<1024x128xbf16>, vector<8x128xf32> -> vector<8x128xf32>
    %6 = vector.broadcast %2 : vector<1x128xf32> to vector<8x128xf32>
    %7 = arith.addf %5, %6 : vector<8x128xf32>
    %cst_9 = arith.constant 0.000000e+00 : f32
    %8 = vector.broadcast %cst_9 : f32 to vector<8x128xf32>
    %9 = arith.maximumf %7, %8 : vector<8x128xf32>
    %10 = arith.truncf %9 : vector<8x128xf32> to vector<8x128xbf16>
    %cst_10 = arith.constant dense<0.000000e+00> : vector<8x128xf32>
    %11 = tpu.matmul %10, %3, %cst_10 {dimension_numbers = #tpu.dot_dimension_numbers<[1], [0], [0], [1], [0, 0, 1, 1], [], []>} : vector<8x128xbf16>, vector<128x128xbf16>, vector<8x128xf32> -> vector<8x128xf32>
    %12 = vector.broadcast %4 : vector<1x128xf32> to vector<8x128xf32>
    %13 = arith.addf %11, %12 : vector<8x128xf32>
    %c0_11 = arith.constant 0 : index
    %c0_12 = arith.constant 0 : index
    %14 = vector.load %arg12[%c0_11, %c0_12] : memref<8x128xf32, #tpu.memory_space<vmem>>, vector<8x128xf32>
    tpu.vector_store %arg12[%c0_11, %c0_12], %13 {strides = array<i32>} : memref<8x128xf32, #tpu.memory_space<vmem>>, vector<8x128xf32>,
    %15 = vector.extract_strided_slice %13 {offsets = [0, 0], sizes = [8, 64], strides = [1, 1]} : vector<8x128xf32> to vector<8x64xf32>
    %16 = vector.extract_strided_slice %13 {offsets = [0, 64], sizes = [8, 64], strides = [1, 1]} : vector<8x128xf32> to vector<8x64xf32>
    %c0_13 = arith.constant 0 : index
    %c0_14 = arith.constant 0 : index
    %17 = vector.load %arg2[%c0_13, %c0_14] : memref<8x64xf32, #tpu.memory_space<vmem>>, vector<8x64xf32>
    %cst_15 = arith.constant 5.000000e-01 : f32
    %18 = vector.broadcast %cst_15 : f32 to vector<8x64xf32>
    %19 = arith.mulf %18, %16 : vector<8x64xf32>
    %20 = math.exp %19 : vector<8x64xf32>
    %21 = arith.mulf %17, %20 : vector<8x64xf32>
    %22 = arith.addf %15, %21 : vector<8x64xf32>
    %c0_16 = arith.constant 0 : index
    %c0_17 = arith.constant 0 : index
    %23 = vector.load %arg7[%c0_16, %c0_17] : memref<64x128xbf16, #tpu.memory_space<vmem>>, vector<64x128xbf16>
    %c0_18 = arith.constant 0 : index
    %c0_19 = arith.constant 0 : index
    %24 = vector.load %arg8[%c0_18, %c0_19] : memref<1x128xf32, #tpu.memory_space<vmem>>, vector<1x128xf32>
    %c0_20 = arith.constant 0 : index
    %c0_21 = arith.constant 0 : index
    %25 = vector.load %arg9[%c0_20, %c0_21] : memref<128x1024xbf16, #tpu.memory_space<vmem>>, vector<128x1024xbf16>
    %c0_22 = arith.constant 0 : index
    %c0_23 = arith.constant 0 : index
    %26 = vector.load %arg10[%c0_22, %c0_23] : memref<1x1024xf32, #tpu.memory_space<vmem>>, vector<1x1024xf32>
    %27 = arith.truncf %22 : vector<8x64xf32> to vector<8x64xbf16>
    %cst_24 = arith.constant dense<0.000000e+00> : vector<8x128xf32>
    %28 = tpu.matmul %27, %23, %cst_24 {dimension_numbers = #tpu.dot_dimension_numbers<[1], [0], [0], [1], [0, 0, 1, 1], [], []>} : vector<8x64xbf16>, vector<64x128xbf16>, vector<8x128xf32> -> vector<8x128xf32>
    %29 = vector.broadcast %24 : vector<1x128xf32> to vector<8x128xf32>
    %30 = arith.addf %28, %29 : vector<8x128xf32>
    %cst_25 = arith.constant 0.000000e+00 : f32
    %31 = vector.broadcast %cst_25 : f32 to vector<8x128xf32>
    %32 = arith.maximumf %30, %31 : vector<8x128xf32>
    %33 = arith.truncf %32 : vector<8x128xf32> to vector<8x128xbf16>
    %cst_26 = arith.constant dense<0.000000e+00> : vector<8x1024xf32>
    %34 = tpu.matmul %33, %25, %cst_26 {dimension_numbers = #tpu.dot_dimension_numbers<[1], [0], [0], [1], [0, 0, 1, 1], [], []>} : vector<8x128xbf16>, vector<128x1024xbf16>, vector<8x1024xf32> -> vector<8x1024xf32>
    %35 = vector.broadcast %26 : vector<1x1024xf32> to vector<8x1024xf32>
    %36 = arith.addf %34, %35 : vector<8x1024xf32>
    %37 = arith.negf %36 : vector<8x1024xf32>
    %38 = math.exp %37 : vector<8x1024xf32>
    %cst_27 = arith.constant 1.000000e+00 : f32
    %39 = vector.broadcast %cst_27 : f32 to vector<8x1024xf32>
    %40 = arith.addf %39, %38 : vector<8x1024xf32>
    %41 = arith.divf %39, %40 : vector<8x1024xf32>
    %c0_28 = arith.constant 0 : index
    %c0_29 = arith.constant 0 : index
    %42 = vector.load %arg11[%c0_28, %c0_29] : memref<8x1024xf32, #tpu.memory_space<vmem>>, vector<8x1024xf32>
    tpu.vector_store %arg11[%c0_28, %c0_29], %41 {strides = array<i32>} : memref<8x1024xf32, #tpu.memory_space<vmem>>, vector<8x1024xf32>,
    return
  }
  func.func @transform_0(%arg0: i32) -> (i32, i32) {
    %c0_i32 = arith.constant 0 : i32
    %c0_i32_0 = arith.constant 0 : i32
    return %arg0, %c0_i32 : i32, i32
  }
  func.func @transform_1(%arg0: i32) -> (i32, i32) {
    %c0_i32 = arith.constant 0 : i32
    %c0_i32_0 = arith.constant 0 : i32
    return %arg0, %c0_i32 : i32, i32
  }
  func.func @transform_2(%arg0: i32) -> (i32, i32) {
    %c0_i32 = arith.constant 0 : i32
    %c0_i32_0 = arith.constant 0 : i32
    %c0_i32_1 = arith.constant 0 : i32
    return %c0_i32, %c0_i32_0 : i32, i32
  }
  func.func @transform_3(%arg0: i32) -> (i32, i32) {
    %c0_i32 = arith.constant 0 : i32
    %c0_i32_0 = arith.constant 0 : i32
    %c0_i32_1 = arith.constant 0 : i32
    return %c0_i32, %c0_i32_0 : i32, i32
  }
  func.func @transform_4(%arg0: i32) -> (i32, i32) {
    %c0_i32 = arith.constant 0 : i32
    %c0_i32_0 = arith.constant 0 : i32
    %c0_i32_1 = arith.constant 0 : i32
    return %c0_i32, %c0_i32_0 : i32, i32
  }
  func.func @transform_5(%arg0: i32) -> (i32, i32) {
    %c0_i32 = arith.constant 0 : i32
    %c0_i32_0 = arith.constant 0 : i32
    %c0_i32_1 = arith.constant 0 : i32
    return %c0_i32, %c0_i32_0 : i32, i32
  }
  func.func @transform_6(%arg0: i32) -> (i32, i32) {
    %c0_i32 = arith.constant 0 : i32
    %c0_i32_0 = arith.constant 0 : i32
    %c0_i32_1 = arith.constant 0 : i32
    return %c0_i32, %c0_i32_0 : i32, i32
  }
  func.func @transform_7(%arg0: i32) -> (i32, i32) {
    %c0_i32 = arith.constant 0 : i32
    %c0_i32_0 = arith.constant 0 : i32
    %c0_i32_1 = arith.constant 0 : i32
    return %c0_i32, %c0_i32_0 : i32, i32
  }
  func.func @transform_8(%arg0: i32) -> (i32, i32) {
    %c0_i32 = arith.constant 0 : i32
    %c0_i32_0 = arith.constant 0 : i32
    %c0_i32_1 = arith.constant 0 : i32
    return %c0_i32, %c0_i32_0 : i32, i32
  }
  func.func @transform_9(%arg0: i32) -> (i32, i32) {
    %c0_i32 = arith.constant 0 : i32
    %c0_i32_0 = arith.constant 0 : i32
    %c0_i32_1 = arith.constant 0 : i32
    return %c0_i32, %c0_i32_0 : i32, i32
  }
  func.func @transform_10(%arg0: i32) -> (i32, i32) {
    %c0_i32 = arith.constant 0 : i32
    %c0_i32_0 = arith.constant 0 : i32
    return %arg0, %c0_i32 : i32, i32
  }
  func.func @transform_11(%arg0: i32) -> (i32, i32) {
    %c0_i32 = arith.constant 0 : i32
    %c0_i32_0 = arith.constant 0 : i32
    return %arg0, %c0_i32 : i32, i32
  }
}

</mosaic_0001>

<bundles_post_ra>
// kernel: tpu_custom_call.1
= control target key start
LH: loop header
LB: loop body
LE: loop exit
PB: predicated region body
PF: predicated region fallthrough
CT: control target
= control target key end

     0   :  { %17 = vsyncpa [#allocation3], 0  ;;  %s2462_s0 = inlined_call_operand.hbm [shape: bf16[8,1024], index: 0, kind: input, shape index: {}]   ;;  %s2463_s1 = inlined_call_operand.hbm [shape: f32[8,64], index: 1, kind: input, shape index: {}]   ;;  %s2464_s2 = inlined_call_operand.hbm [shape: bf16[1024,128], index: 2, kind: input, shape index: {}]   ;;  %s2465_s3 = inlined_call_operand.vmem [shape: f32[1,128], index: 3, kind: input, shape index: {}]   ;;  %s2466_s4 = inlined_call_operand.hbm [shape: bf16[128,128], index: 4, kind: input, shape index: {}]   ;;  %s2467_s5 = inlined_call_operand.vmem [shape: f32[1,128], index: 5, kind: input, shape index: {}]   ;;  %s2468_s6 = inlined_call_operand.hbm [shape: bf16[64,128], index: 6, kind: input, shape index: {}]   ;;  %s2469_s7 = inlined_call_operand.vmem [shape: f32[1,128], index: 7, kind: input, shape index: {}]   ;;  %s2470_s8 = inlined_call_operand.hbm [shape: bf16[128,1024], index: 8, kind: input, shape index: {}]   ;;  %s2471_s9 = inlined_call_operand.vmem [shape: f32[1,1024], index: 9, kind: input, shape index: {}]   ;;  %s2472_s10 = inlined_call_operand.hbm [shape: f32[8,1024], index: 10, kind: output, shape index: {0}]   ;;  %s2473_s11 = inlined_call_operand.hbm [shape: f32[8,128], index: 11, kind: output, shape index: {1}]  }
   0x1   :  { %18 = vsyncpa [#allocation6], 0 }
   0x2   :  { %19 = vsyncpa [#allocation9], 0 }
   0x3   :  { %20 = vsyncpa [#allocation12], 0 }
   0x4   :  { %21 = vsyncpa [#allocation4], 0 }
   0x5   :  { %22 = vsyncpa [#allocation15], 0  ;;  %s2316_s17 = smov [#allocation5]  }
   0x6   :  { %s39_s18 = sshll.u32 %s2316_s17, 4  ;;  %s40_s18 = int_to_ptr.vmem [resolvable:$true] %s39_s18 }
   0x7   :  { %s2152_s19 = scalar_lea.vmem %s40_s18, 128  ;;  %p2157_p1 = scmp.lt.s32.totalorder %s40_s18, %s40_s18 }
   0x8   :  { %p2153_p0 = scmp.ne.s32.totalorder %s40_s18, %s2152_s19  ;;  %p2158_p2 = scmp.lt.s32.totalorder %s2152_s19, %s2152_s19 }
   0xa   :  { %p2159_p3 = por %p2158_p2, %p2157_p1 }
   0xc   :  { %p2160_p4 = pnand %p2159_p3, %p2153_p0 }
   0xe   :  { %2163 = shalt.err (!%p2160_p4)
}
   0xf   :  { %42 = dma.hbm_to_vmem [thread:$0]  %s2463_s1, 128, %s40_s18, [#allocation6]  }
  0x10   :  { %s2317_s22 = smov [#allocation8]   ;;  %s2318_s24 = smov [#allocation2]  }
  0x11   :  { %s62_s23 = sshll.u32 %s2317_s22, 4  ;;  %s29_s25 = sshll.u32 %s2318_s24, 4  ;;  %s63_s23 = int_to_ptr.vmem [resolvable:$true] %s62_s23  ;;  %s30_s25 = int_to_ptr.vmem [resolvable:$true] %s29_s25 }
  0x12   :  { %s2172_s26 = scalar_lea.vmem %s63_s23, 1024  ;;  %p2177_p6 = scmp.lt.s32.totalorder %s63_s23, %s63_s23 }
  0x13   :  { %p2173_p5 = scmp.ne.s32.totalorder %s63_s23, %s2172_s26  ;;  %p2178_p7 = scmp.lt.s32.totalorder %s2172_s26, %s2172_s26 }
  0x15   :  { %p2179_p8 = por %p2178_p7, %p2177_p6 }
  0x17   :  { %p2180_p9 = pnand %p2179_p8, %p2173_p5 }
  0x19   :  { %2183 = shalt.err (!%p2180_p9)
}
  0x1a   :  { %s2319_s27 = smov 64   ;;  %s2320_s28 = smov 4  }
  0x1b   :  { %68 = dma.hbm_to_vmem [thread:$0]  %s2466_s4, 1024, %s63_s23, [#allocation9], %s2319_s27, %s2319_s27, %s2320_s28  }
  0x1c   :  { %s2192_s1 = scalar_lea.vmem %s30_s25, 512  ;;  %p2197_p11 = scmp.lt.s32.totalorder %s30_s25, %s30_s25 }
  0x1d   :  { %p2193_p10 = scmp.ne.s32.totalorder %s30_s25, %s2192_s1  ;;  %p2198_p12 = scmp.lt.s32.totalorder %s2192_s1, %s2192_s1 }
  0x1f   :  { %p2199_p13 = por %p2198_p12, %p2197_p11 }
  0x21   :  { %p2200_p0 = pnand %p2199_p13, %p2193_p10 }
  0x23   :  { %2203 = shalt.err (!%p2200_p0)
}
  0x24   :  { %32 = dma.hbm_to_vmem [thread:$0]  %s2462_s0, 512, %s30_s25, [#allocation3]  }
  0x25   :  { %s2321_s14 = smov [#allocation7]   ;;  %s2322_s16 = smov [#allocation10]  }
  0x26   :  { %s48_s15 = sshll.u32 %s2321_s14, 4  ;;  %s76_s17 = sshll.u32 %s2322_s16, 4  ;;  %s49_s15 = int_to_ptr.vmem [resolvable:$true] %s48_s15  ;;  %s77_s17 = int_to_ptr.vmem [resolvable:$true] %s76_s17 }
  0x27   :  { %s2212_s18 = scalar_lea.vmem %s49_s15, 8192  ;;  %p2217_p2 = scmp.lt.s32.totalorder %s49_s15, %s49_s15 }
  0x28   :  { %p2213_p1 = scmp.ne.s32.totalorder %s49_s15, %s2212_s18  ;;  %p2218_p3 = scmp.lt.s32.totalorder %s2212_s18, %s2212_s18 }
  0x2a   :  { %p2219_p4 = por %p2218_p3, %p2217_p2 }
  0x2c   :  { %p2220_p5 = pnand %p2219_p4, %p2213_p1 }
  0x2e   :  { %2223 = shalt.err (!%p2220_p5)
}
  0x2f   :  { %54 = dma.hbm_to_vmem [thread:$0]  %s2464_s2, 8192, %s49_s15, [#allocation6], %s2319_s27, %s2319_s27, %s2320_s28  }
  0x30   :  { %s2232_s0 = scalar_lea.vmem %s77_s17, 512  ;;  %p2237_p7 = scmp.lt.s32.totalorder %s77_s17, %s77_s17 }
  0x31   :  { %p2233_p6 = scmp.ne.s32.totalorder %s77_s17, %s2232_s0  ;;  %p2238_p8 = scmp.lt.s32.totalorder %s2232_s0, %s2232_s0 }
  0x33   :  { %p2239_p9 = por %p2238_p8, %p2237_p7 }
  0x35   :  { %p2240_p10 = pnand %p2239_p9, %p2233_p6 }
  0x37   :  { %2243 = shalt.err (!%p2240_p10)
}
  0x38   :  { %82 = dma.hbm_to_vmem [thread:$0]  %s2468_s6, 512, %s77_s17, [#allocation9], %s2319_s27, %s2319_s27, %s2320_s28  }
  0x39   :  { %s2323_s22 = smov [#allocation11]  }
  0x3a   :  { %s90_s23 = sshll.u32 %s2323_s22, 4  ;;  %s91_s23 = int_to_ptr.vmem [resolvable:$true] %s90_s23 }
  0x3b   :  { %s2252_s24 = scalar_lea.vmem %s91_s23, 8192  ;;  %p2257_p12 = scmp.lt.s32.totalorder %s91_s23, %s91_s23 }
  0x3c   :  { %p2253_p11 = scmp.ne.s32.totalorder %s91_s23, %s2252_s24  ;;  %p2258_p13 = scmp.lt.s32.totalorder %s2252_s24, %s2252_s24 }
  0x3e   :  { %p2259_p0 = por %p2258_p13, %p2257_p12 }
  0x40   :  { %p2260_p1 = pnand %p2259_p0, %p2253_p11 }
  0x42   :  { %2263 = shalt.err (!%p2260_p1)
}
  0x43   :  { %s2324_s2 = smov 512   ;;  %s2325_s25 = smov 32  }
  0x44   :  { %96 = dma.hbm_to_vmem [thread:$0]  %s2470_s8, 8192, %s91_s23, [#allocation12], %s2324_s2, %s2324_s2, %s2325_s25  }
  0x45   :  { %2304 = dma.done.wait [#allocation3], 512  }
  0x46   :  { %2305 = vsyncadd [#allocation3], 4294966784 }
  0x47   :  { %2306 = dma.done.wait [#allocation6], 8320  }
  0x48   :  { %2307 = vsyncadd [#allocation6], 4294958976 }
  0x49   :  { %2308 = dma.done.wait [#allocation9], 1536  }
  0x4a   :  { %2309 = vsyncadd [#allocation9], 4294965760 }
  0x4b   :  { %2310 = dma.done.wait [#allocation12], 8192  }
  0x4c   :  { %2311 = vsyncadd [#allocation12], 4294959104  ;;  %v2026_v0 = vld [vmem:[#allocation7 + $0x78] sm:$0xff]   ;;  %v2030_v4 = vld [vmem:[#allocation7 + $0x70] sm:$0xff]   ;;  %vm2327_vm0 = vmmov 0   ;;  %vm1058_vm1 = vcmask 523264  }
  0x4d   :  { %v2027_v1 = vld [vmem:[#allocation7 + $0xf8] sm:$0xff]   ;;  %1877 = vmatprep.subr.bf16.mxu0 %v2026_v0  ;;  %v2031_v5 = vld [vmem:[#allocation7 + $0xf0] sm:$0xff]   ;;  %v2034_v8 = vld [vmem:[#allocation7 + $0x68] sm:$0xff]  }
  0x4e   :  { %v2028_v2 = vld [vmem:[#allocation7 + $0x38] sm:$0xff]   ;;  %1899 = vmatprep.subr.bf16.mxu1 %v2027_v1  ;;  %v2032_v6 = vld [vmem:[#allocation7 + $0x30] sm:$0xff]   ;;  %v2035_v9 = vld [vmem:[#allocation7 + $0xe8] sm:$0xff]  }
  0x4f   :  { %v2029_v3 = vld [vmem:[#allocation7 + $0xb8] sm:$0xff]   ;;  %1878 = vmatpush3.bf16.msra.mxu0 %v2028_v2  ;;  %v2033_v7 = vld [vmem:[#allocation7 + $0xb0] sm:$0xff]   ;;  %v2036_v10 = vld [vmem:[#allocation7 + $0x28] sm:$0xff]  }
  0x50   :  { %1900 = vmatpush3.bf16.msra.mxu1 %v2029_v3  ;;  %1879 = vmatprep.subr.bf16.mxu0 %v2030_v4  ;;  %v2037_v11 = vld [vmem:[#allocation7 + $0xa8] sm:$0xff]   ;;  %v2038_v12 = vld [vmem:[#allocation7 + $0x60] sm:$0xff]   ;;  %v2042_v16 = vld [vmem:[#allocation7 + $0x58] sm:$0xff]  }
  0x51   :  { %1901 = vmatprep.subr.bf16.mxu1 %v2031_v5  ;;  %v2039_v13 = vld [vmem:[#allocation7 + $0xe0] sm:$0xff]   ;;  %v2043_v17 = vld [vmem:[#allocation7 + $0xd8] sm:$0xff]   ;;  %v2046_v20 = vld [vmem:[#allocation7 + $0x50] sm:$0xff]  }
  0x52   :  { %v2040_v14 = vld [vmem:[#allocation7 + $0x20] sm:$0xff]   ;;  %v2044_v18 = vld [vmem:[#allocation7 + $0x18] sm:$0xff]   ;;  %v2047_v21 = vld [vmem:[#allocation7 + $0xd0] sm:$0xff]  }
  0x53   :  { %1880 = vmatpush3.bf16.msra.mxu0 %v2032_v6  ;;  %v2041_v15 = vld [vmem:[#allocation7 + $0xa0] sm:$0xff]   ;;  %v2045_v19 = vld [vmem:[#allocation7 + $0x98] sm:$0xff]   ;;  %v2048_v22 = vld [vmem:[#allocation7 + $0x10] sm:$0xff]  }
  0x54   :  { %1902 = vmatpush3.bf16.msra.mxu1 %v2033_v7  ;;  %1881 = vmatprep.subr.bf16.mxu0 %v2034_v8  ;;  %v2049_v23 = vld [vmem:[#allocation7 + $0x90] sm:$0xff]   ;;  %v2050_v24 = vld [vmem:[#allocation7 + $0x48] sm:$0xff]   ;;  %v2054_v28 = vld [vmem:[#allocation7 + $0x40] sm:$0xff]  }
  0x55   :  { %1903 = vmatprep.subr.bf16.mxu1 %v2035_v9  ;;  %v2051_v25 = vld [vmem:[#allocation7 + $0xc8] sm:$0xff]   ;;  %v2055_v29 = vld [vmem:[#allocation7 + $0xc0] sm:$0xff]   ;;  %v118_v32 = vld [vmem:[#allocation2] sm:$0xff] }
  0x56   :  { %v2052_v26 = vld [vmem:[#allocation7 + $0x8] sm:$0xff]   ;;  %v2056_v30 = vld [vmem:[#allocation7] sm:$0xff]   ;;  %v1718_v34 = vcombine.low %v118_v32, %v118_v32  ;;  %v1719_v35 = vcombine.high %v118_v32, %v118_v32  ;;  %v2062_v38 = vld [vmem:[#allocation7 + $0x178] sm:$0xff]  }
  0x57   :  { %1882 = vmatpush3.bf16.msra.mxu0 %v2036_v10  ;;  %v2053_v27 = vld [vmem:[#allocation7 + $0x88] sm:$0xff]   ;;  %v2057_v31 = vld [vmem:[#allocation7 + $0x80] sm:$0xff]   ;;  %v2063_v39 = vld [vmem:[#allocation7 + $0x1f8] sm:$0xff]  }
  0x58   :  { %1904 = vmatpush3.bf16.msra.mxu1 %v2037_v11  ;;  %1883 = vmatprep.subr.bf16.mxu0 %v2038_v12  ;;  %v119_v33 = vld [vmem:[#allocation2 + $0x8] sm:$0xff]  ;;  %v2064_v40 = vld [vmem:[#allocation7 + $0x138] sm:$0xff]   ;;  %v2066_v42 = vld [vmem:[#allocation7 + $0x170] sm:$0xff]  }
  0x59   :  { %1905 = vmatprep.subr.bf16.mxu1 %v2039_v13  ;;  %v1720_v36 = vcombine.low %v119_v33, %v119_v33  ;;  %v1721_v37 = vcombine.high %v119_v33, %v119_v33  ;;  %718 = vmatprep.mubr.bf16.mxu0 %v1719_v35  ;;  %v2065_v41 = vld [vmem:[#allocation7 + $0x1b8] sm:$0xff]   ;;  %v2067_v43 = vld [vmem:[#allocation7 + $0x1f0] sm:$0xff]   ;;  %v2070_v46 = vld [vmem:[#allocation7 + $0x168] sm:$0xff]   ;;  %v2326_v13 = vmov 0.0  }
  0x5a   :  { %v2068_v44 = vld [vmem:[#allocation7 + $0x130] sm:$0xff]   ;;  %v2071_v47 = vld [vmem:[#allocation7 + $0x1e8] sm:$0xff]   ;;  %v2074_v50 = vld [vmem:[#allocation7 + $0x160] sm:$0xff]  }
  0x5b   :  { %1884 = vmatpush3.bf16.msra.mxu0 %v2040_v14  ;;  %758 = vmatprep.mubr.bf16.mxu1 %v1721_v37  ;;  %v2069_v45 = vld [vmem:[#allocation7 + $0x1b0] sm:$0xff]   ;;  %v2072_v48 = vld [vmem:[#allocation7 + $0x128] sm:$0xff]   ;;  %v2075_v51 = vld [vmem:[#allocation7 + $0x1e0] sm:$0xff]  }
  0x5c   :  { %1906 = vmatpush3.bf16.msra.mxu1 %v2041_v15  ;;  %1885 = vmatprep.subr.bf16.mxu0 %v2042_v16  ;;  %v2073_v49 = vld [vmem:[#allocation7 + $0x1a8] sm:$0xff]   ;;  %v2076_v52 = vld [vmem:[#allocation7 + $0x120] sm:$0xff]   ;;  %v2078_v54 = vld [vmem:[#allocation7 + $0x158] sm:$0xff]  }
  0x5d   :  { %1907 = vmatprep.subr.bf16.mxu1 %v2043_v17  ;;  %v2077_v53 = vld [vmem:[#allocation7 + $0x1a0] sm:$0xff]   ;;  %v2079_v55 = vld [vmem:[#allocation7 + $0x1d8] sm:$0xff]   ;;  %v2082_v58 = vld [vmem:[#allocation7 + $0x150] sm:$0xff]  }
  0x5e   :  { %v2080_v56 = vld [vmem:[#allocation7 + $0x118] sm:$0xff]   ;;  %v2083_v59 = vld [vmem:[#allocation7 + $0x1d0] sm:$0xff]   ;;  %v2086_v62 = vld [vmem:[#allocation7 + $0x148] sm:$0xff]  }
  0x5f   :  { %1886 = vmatpush3.bf16.msra.mxu0 %v2044_v18  ;;  %v2081_v57 = vld [vmem:[#allocation7 + $0x198] sm:$0xff]   ;;  %v2084_v60 = vld [vmem:[#allocation7 + $0x110] sm:$0xff]   ;;  %v2087_v63 = vld [vmem:[#allocation7 + $0x1c8] sm:$0xff]  }
  0x60   :  { %1908 = vmatpush3.bf16.msra.mxu1 %v2045_v19  ;;  %1887 = vmatprep.subr.bf16.mxu0 %v2046_v20  ;;  %v2085_v61 = vld [vmem:[#allocation7 + $0x190] sm:$0xff]   ;;  %v2088_v0 = vld [vmem:[#allocation7 + $0x108] sm:$0xff]   ;;  %v2090_v2 = vld [vmem:[#allocation7 + $0x140] sm:$0xff]  }
  0x61   :  { %1909 = vmatprep.subr.bf16.mxu1 %v2047_v21  ;;  %v2089_v1 = vld [vmem:[#allocation7 + $0x188] sm:$0xff]   ;;  %v2091_v3 = vld [vmem:[#allocation7 + $0x1c0] sm:$0xff]   ;;  %v121_v9 = vld [vmem:[#allocation2 + $0x18] sm:$0xff] }
  0x62   :  { %v2092_v4 = vld [vmem:[#allocation7 + $0x100] sm:$0xff]   ;;  %v120_v6 = vld [vmem:[#allocation2 + $0x10] sm:$0xff]  ;;  %v1724_v10 = vcombine.low %v121_v9, %v121_v9  ;;  %v1725_v11 = vcombine.high %v121_v9, %v121_v9  ;;  %v2098_v12 = vld [vmem:[#allocation8 + $0x38] sm:$0xff]  }
  0x63   :  { %1888 = vmatpush3.bf16.msra.mxu0 %v2048_v22  ;;  %v2093_v5 = vld [vmem:[#allocation7 + $0x180] sm:$0xff]   ;;  %v1722_v7 = vcombine.low %v120_v6, %v120_v6  ;;  %v1723_v8 = vcombine.high %v120_v6, %v120_v6  ;;  %v2099_v14 = vld [vmem:[#allocation8 + $0x30] sm:$0xff]   ;;  %v2100_v15 = vld [vmem:[#allocation8 + $0x28] sm:$0xff]  }
  0x64   :  { %1910 = vmatpush3.bf16.msra.mxu1 %v2049_v23  ;;  %1889 = vmatprep.subr.bf16.mxu0 %v2050_v24  ;;  %v2101_v16 = vld [vmem:[#allocation8 + $0x20] sm:$0xff]   ;;  %v2102_v17 = vld [vmem:[#allocation8 + $0x18] sm:$0xff]   ;;  %v2103_v18 = vld [vmem:[#allocation8 + $0x10] sm:$0xff]  }
  0x65   :  { %1911 = vmatprep.subr.bf16.mxu1 %v2051_v25  ;;  %v2104_v19 = vld [vmem:[#allocation8 + $0x8] sm:$0xff]   ;;  %v2105_v20 = vld [vmem:[#allocation8] sm:$0xff]  }
  0x66   :  { %v1003_v9 = vld [vmem:[#allocation11 + $0x148] sm:$0xff] }
  0x67   :  { %1890 = vmatpush3.bf16.msra.mxu0 %v2052_v26 }
  0x68   :  { %1912 = vmatpush3.bf16.msra.mxu1 %v2053_v27  ;;  %1891 = vmatprep.subr.bf16.mxu0 %v2054_v28 }
  0x69   :  { %1913 = vmatprep.subr.bf16.mxu1 %v2055_v29 }
  0x6b   :  { %1892 = vmatpush3.bf16.msra.mxu0 %v2056_v30  ;;  %v1717_v30 = vld [vmem:[%s2465_s3] ss:$0 sm:$0xff] }
  0x6c   :  { %1914 = vmatpush3.bf16.msra.mxu1 %v2057_v31  ;;  %1921 = vmatprep.subr.bf16.mxu0 %v2062_v38 }
  0x6d   :  { %1943 = vmatprep.subr.bf16.mxu1 %v2063_v39 }
  0x6e   :  { %719 = vmatmul.mubr.bf16.vlgmr.msra.gmra.mxu0 %v1718_v34 }
  0x6f   :  { %759 = vmatmul.mubr.bf16.vlgmr.msra.gmra.mxu1 %v1720_v36  ;;  %1922 = vmatpush3.bf16.msra.mxu0 %v2064_v40 }
  0x70   :  { %1944 = vmatpush3.bf16.msra.mxu1 %v2065_v41  ;;  %1923 = vmatprep.subr.bf16.mxu0 %v2066_v42 }
  0x71   :  { %1945 = vmatprep.subr.bf16.mxu1 %v2067_v43  ;;  %798 = vmatprep.mubr.bf16.mxu0 %v1723_v8 }
  0x72   :  { %838 = vmatprep.mubr.bf16.mxu1 %v1725_v11 }
  0x73   :  { %1924 = vmatpush3.bf16.msra.mxu0 %v2068_v44 }
  0x74   :  { %1946 = vmatpush3.bf16.msra.mxu1 %v2069_v45  ;;  %1925 = vmatprep.subr.bf16.mxu0 %v2070_v46 }
  0x75   :  { %1947 = vmatprep.subr.bf16.mxu1 %v2071_v47 }
  0x77   :  { %1926 = vmatpush3.bf16.msra.mxu0 %v2072_v48  ;;  %v2106_v48 = vld [vmem:[#allocation10 + $0x18] sm:$0xff]  }
  0x78   :  { %1948 = vmatpush3.bf16.msra.mxu1 %v2073_v49  ;;  %1927 = vmatprep.subr.bf16.mxu0 %v2074_v50  ;;  %v2107_v49 = vld [vmem:[#allocation10 + $0x10] sm:$0xff]   ;;  %v1790_v50 = vld [vmem:[%s2467_s5] ss:$0 sm:$0xff] }
  0x79   :  { %1949 = vmatprep.subr.bf16.mxu1 %v2075_v51 }
  0x7b   :  { %1928 = vmatpush3.bf16.msra.mxu0 %v2076_v52 }
  0x7c   :  { %1950 = vmatpush3.bf16.msra.mxu1 %v2077_v53  ;;  %1929 = vmatprep.subr.bf16.mxu0 %v2078_v54 }
  0x7d   :  { %1951 = vmatprep.subr.bf16.mxu1 %v2079_v55 }
  0x7f   :  { %1930 = vmatpush3.bf16.msra.mxu0 %v2080_v56 }
  0x80   :  { %1952 = vmatpush3.bf16.msra.mxu1 %v2081_v57  ;;  %1931 = vmatprep.subr.bf16.mxu0 %v2082_v58  ;;  %v2108_v57 = vld [vmem:[#allocation10 + $0x8] sm:$0xff]  }
  0x81   :  { %1953 = vmatprep.subr.bf16.mxu1 %v2083_v59  ;;  %v2109_v59 = vld [vmem:[#allocation10] sm:$0xff]  }
  0x83   :  { %1932 = vmatpush3.bf16.msra.mxu0 %v2084_v60  ;;  %v1018_v60 = vld [vmem:[#allocation11 + $0x1c0] sm:$0xff] }
  0x84   :  { %1954 = vmatpush3.bf16.msra.mxu1 %v2085_v61  ;;  %1933 = vmatprep.subr.bf16.mxu0 %v2086_v62  ;;  %v1022_v61 = vld [vmem:[#allocation11 + $0x1e0] sm:$0xff]  ;;  %v1019_v62 = vld [vmem:[#allocation11 + $0x1c8] sm:$0xff] }
  0x85   :  { %1955 = vmatprep.subr.bf16.mxu1 %v2087_v63  ;;  %v1861_v63 = vcombine.low %v1018_v60, %v1022_v61 }
  0x87   :  { %1934 = vmatpush3.bf16.msra.mxu0 %v2088_v0  ;;  %v1862_v0 = vcombine.high %v1018_v60, %v1022_v61  ;;  %v963_v60 = vld [vmem:[#allocation11 + $0x8] sm:$0xff] }
  0x88   :  { %1956 = vmatpush3.bf16.msra.mxu1 %v2089_v1  ;;  %1935 = vmatprep.subr.bf16.mxu0 %v2090_v2  ;;  %v1023_v1 = vld [vmem:[#allocation11 + $0x1e8] sm:$0xff] }
  0x89   :  { %1957 = vmatprep.subr.bf16.mxu1 %v2091_v3  ;;  %v1863_v2 = vcombine.low %v1019_v62, %v1023_v1  ;;  %v1864_v3 = vcombine.high %v1019_v62, %v1023_v1  ;;  %v967_v62 = vld [vmem:[#allocation11 + $0x28] sm:$0xff] }
  0x8a   :  { %v1808_v1 = vcombine.high %v963_v60, %v967_v62 }
  0x8b   :  { %1936 = vmatpush3.bf16.msra.mxu0 %v2092_v4  ;;  %v1011_v4 = vld [vmem:[#allocation11 + $0x188] sm:$0xff] }
  0x8c   :  { %1958 = vmatpush3.bf16.msra.mxu1 %v2093_v5  ;;  %1979 = vmatprep.subr.bf16.mxu0 %v2326_v13  ;;  %v1015_v5 = vld [vmem:[#allocation11 + $0x1a8] sm:$0xff] }
  0x8d   :  { %1999 = vmatprep.subr.bf16.mxu1 %v2326_v13  ;;  %v1856_v6 = vcombine.high %v1011_v4, %v1015_v5 }
  0x8e   :  { %799 = vmatmul.mubr.bf16.vlgmr.msra.gmra.mxu0 %v1722_v7  ;;  %v1855_v7 = vcombine.low %v1011_v4, %v1015_v5  ;;  %v1021_v4 = vld [vmem:[#allocation11 + $0x1d8] sm:$0xff] }
  0x8f   :  { %839 = vmatmul.mubr.bf16.vlgmr.msra.gmra.mxu1 %v1724_v10  ;;  %1980 = vmatpush3.bf16.msra.mxu0 %v2098_v12  ;;  %v1007_v10 = vld [vmem:[#allocation11 + $0x168] sm:$0xff] }
  0x90   :  { %1981 = vmatprep.subr.bf16.mxu0 %v2326_v13  ;;  %1995 = vmatprep.mubr.msk.bf16.mxu0 %vm2327_vm0, %v2326_v13  ;;  %v1848_v11 = vcombine.high %v1003_v9, %v1007_v10  ;;  %v1847_v12 = vcombine.low %v1003_v9, %v1007_v10  ;;  %v2328_v10 = vmov 0  }
  0x91   :  { %2007 = vmatprep.mubr.msk.bf16.mxu1 %vm2327_vm0, %v2326_v13  ;;  %2000 = vmatpush3.bf16.msra.mxu1 %v2106_v48 }
  0x92   :  { %2001 = vmatprep.subr.bf16.mxu1 %v2326_v13 }
  0x93   :  { %1982 = vmatpush3.bf16.msra.mxu0 %v2099_v14  ;;  %v999_v14 = vld [vmem:[#allocation11 + $0x128] sm:$0xff] }
  0x94   :  { %1983 = vmatprep.subr.bf16.mxu0 %v2326_v13 }
  0x95   :  { %2002 = vmatpush3.bf16.msra.mxu1 %v2107_v49  ;;  %v978_v49 = vld [vmem:[#allocation11 + $0x80] sm:$0xff] }
  0x96   :  { %2003 = vmatprep.subr.bf16.mxu1 %v2326_v13 }
  0x97   :  { %1984 = vmatpush3.bf16.msra.mxu0 %v2100_v15 }
  0x98   :  { %1985 = vmatprep.subr.bf16.mxu0 %v2326_v13 }
  0x99   :  { %2004 = vmatpush3.bf16.msra.mxu1 %v2108_v57 }
  0x9a   :  { %2005 = vmatprep.subr.bf16.mxu1 %v2326_v13 }
  0x9b   :  { %1986 = vmatpush3.bf16.msra.mxu0 %v2101_v16 }
  0x9c   :  { %1987 = vmatprep.subr.bf16.mxu0 %v2326_v13 }
  0x9d   :  { %2006 = vmatpush3.bf16.msra.mxu1 %v2109_v59  ;;  %v966_v59 = vld [vmem:[#allocation11 + $0x20] sm:$0xff] }
  0x9e   :  { %1465 = vmatprep.subr.bf16.mxu1 %v1862_v0  ;;  %v1807_v0 = vcombine.low %v963_v60, %v967_v62  ;;  %v977_v60 = vld [vmem:[#allocation11 + $0x78] sm:$0xff] }
  0x9f   :  { %1988 = vmatpush3.bf16.msra.mxu0 %v2102_v17  ;;  %v987_v17 = vld [vmem:[#allocation11 + $0xc8] sm:$0xff] }
  0xa0   :  { %1989 = vmatprep.subr.bf16.mxu0 %v2326_v13 }
  0xa3   :  { %1990 = vmatpush3.bf16.msra.mxu0 %v2103_v18  ;;  %v991_v18 = vld [vmem:[#allocation11 + $0xe8] sm:$0xff] }
  0xa4   :  { %1991 = vmatprep.subr.bf16.mxu0 %v2326_v13 }
  0xa7   :  { %1992 = vmatpush3.bf16.msra.mxu0 %v2104_v19  ;;  %v1832_v19 = vcombine.high %v987_v17, %v991_v18 }
  0xa8   :  { %1993 = vmatprep.subr.bf16.mxu0 %v2326_v13  ;;  %v995_v13 = vld [vmem:[#allocation11 + $0x108] sm:$0xff] }
  0xa9   :  { %v1840_v15 = vcombine.high %v995_v13, %v999_v14  ;;  %v1839_v16 = vcombine.low %v995_v13, %v999_v14  ;;  %v1012_v14 = vld [vmem:[#allocation11 + $0x190] sm:$0xff] }
  0xab   :  { %1994 = vmatpush3.bf16.msra.mxu0 %v2105_v20  ;;  %v1831_v20 = vcombine.low %v987_v17, %v991_v18  ;;  %v1013_v17 = vld [vmem:[#allocation11 + $0x198] sm:$0xff] }
  0xac   :  { %1506 = vmatprep.subr.bf16.mxu0 %v1864_v3  ;;  %v1024_v3 = vld [vmem:[#allocation11 + $0x1f0] sm:$0xff]  ;;  %v1017_v18 = vld [vmem:[#allocation11 + $0x1b8] sm:$0xff] }
 0x12e   :  { %v1893_v21 = vpop.f32.mrf.mxu0 }
 0x12f   :  { %v1915_v22 = vpop.f32.mrf.mxu1 }
 0x130   :  { %v1894_v23 = vpop.f32.mrf.mxu0 }
 0x131   :  { %v1916_v24 = vpop.f32.mrf.mxu1  ;;  %v1895_v29 = vadd.f32 %v1894_v23, %v1893_v21  ;;  %v979_v21 = vld [vmem:[#allocation11 + $0x88] sm:$0xff] }
 0x132   :  { %v1896_v25 = vpop.f32.mrf.mxu0  ;;  %v1917_v32 = vadd.f32 %v1916_v24, %v1915_v22  ;;  %v983_v22 = vld [vmem:[#allocation11 + $0xa8] sm:$0xff] }
 0x133   :  { %v1918_v26 = vpop.f32.mrf.mxu1  ;;  %v721_v31 = vadd.f32 %v1895_v29, %v1717_v30  ;;  %v1824_v23 = vcombine.high %v979_v21, %v983_v22  ;;  %v1823_v24 = vcombine.low %v979_v21, %v983_v22  ;;  %v971_v25 = vld [vmem:[#allocation11 + $0x48] sm:$0xff]  ;;  %v943_v29 = vld [vmem:[#allocation5] sm:$0xff] }
 0x134   :  { %v1897_v27 = vpop.f32.mrf.mxu0  ;;  %v975_v26 = vld [vmem:[#allocation11 + $0x68] sm:$0xff] }
 0x135   :  { %v1919_v28 = vpop.f32.mrf.mxu1  ;;  %v761_v37 = vadd.f32 %v1917_v32, %v721_v31  ;;  %v1816_v27 = vcombine.high %v971_v25, %v975_v26  ;;  %v1010_v32 = vld [vmem:[#allocation11 + $0x180] sm:$0xff] }
 0x136   :  { %v1815_v28 = vcombine.low %v971_v25, %v975_v26  ;;  %v1008_v26 = vld [vmem:[#allocation11 + $0x170] sm:$0xff] }
 0x14e   :  { %v1937_v33 = vpop.f32.mrf.mxu0 }
 0x14f   :  { %v1959_v34 = vpop.f32.mrf.mxu1 }
 0x150   :  { %v1938_v35 = vpop.f32.mrf.mxu0 }
 0x151   :  { %v1960_v36 = vpop.f32.mrf.mxu1  ;;  %v1939_v38 = vadd.f32 %v1938_v35, %v1937_v33  ;;  %v1014_v33 = vld [vmem:[#allocation11 + $0x1a0] sm:$0xff] }
 0x152   :  { %v1940_v39 = vpop.f32.mrf.mxu0  ;;  %v1961_v42 = vadd.f32 %v1960_v36, %v1959_v34  ;;  %v1854_v36 = vcombine.high %v1010_v32, %v1014_v33 }
 0x153   :  { %v1962_v40 = vpop.f32.mrf.mxu1  ;;  %v801_v41 = vadd.f32 %v1939_v38, %v761_v37  ;;  %v1002_v37 = vld [vmem:[#allocation11 + $0x140] sm:$0xff]  ;;  %v1853_v39 = vcombine.low %v1010_v32, %v1014_v33  ;;  %v996_v33 = vld [vmem:[#allocation11 + $0x110] sm:$0xff] }
 0x154   :  { %v1941_v43 = vpop.f32.mrf.mxu0  ;;  %v1006_v38 = vld [vmem:[#allocation11 + $0x160] sm:$0xff] }
 0x155   :  { %v1963_v44 = vpop.f32.mrf.mxu1  ;;  %v841_v45 = vadd.f32 %v1961_v42, %v801_v41  ;;  %v1846_v40 = vcombine.high %v1002_v37, %v1006_v38  ;;  %v994_v41 = vld [vmem:[#allocation11 + $0x100] sm:$0xff]  ;;  %v1845_v43 = vcombine.low %v1002_v37, %v1006_v38 }
 0x156   :  { %v998_v42 = vld [vmem:[#allocation11 + $0x120] sm:$0xff] }
 0x157   :  { %v846_v46 = vmax.f32 %v841_v45, 0.0  ;;  %v1838_v44 = vcombine.high %v994_v41, %v998_v42  ;;  %v986_v45 = vld [vmem:[#allocation11 + $0xc0] sm:$0xff] }
 0x159   :  { %v847_v47 = vpack.c.bf16 %v846_v46, %v846_v46  ;;  %v990_v46 = vld [vmem:[#allocation11 + $0xe0] sm:$0xff] }
 0x15a   :  { %v1830_v48 = vcombine.high %v986_v45, %v990_v46 }
 0x15b   :  { %1996 = vmatmul.mubr.bf16.vlgmr.msra.gmra.mxu0 %v847_v47  ;;  %v1837_v47 = vcombine.low %v994_v41, %v998_v42  ;;  %v988_v41 = vld [vmem:[#allocation11 + $0xd0] sm:$0xff] }
 0x15c   :  { %1507 = vmatpush1.bf16.msra.mxu0 %v1863_v2  ;;  %v1020_v2 = vld [vmem:[#allocation11 + $0x1d0] sm:$0xff]  ;;  %1538 = vmatprep.mubr.bf16.mxu0 %v2328_v10 }
 0x15d   :  { %1508 = vmatprep.subr.bf16.mxu0 %v1856_v6  ;;  %v1866_v5 = vcombine.high %v1020_v2, %v1024_v3  ;;  %v1025_v6 = vld [vmem:[#allocation11 + $0x1f8] sm:$0xff]  ;;  %v992_v42 = vld [vmem:[#allocation11 + $0xf0] sm:$0xff] }
 0x15e   :  { %v1868_v9 = vcombine.high %v1021_v4, %v1025_v6 }
 0x160   :  { %1509 = vmatpush1.bf16.msra.mxu0 %v1855_v7  ;;  %v1865_v7 = vcombine.low %v1020_v2, %v1024_v3  ;;  %v968_v2 = vld [vmem:[#allocation11 + $0x30] sm:$0xff]  ;;  %v965_v3 = vld [vmem:[#allocation11 + $0x18] sm:$0xff] }
 0x161   :  { %1510 = vmatprep.subr.bf16.mxu0 %v1848_v11  ;;  %v1799_v11 = vld [vmem:[%s2469_s7] ss:$0 sm:$0xff]  ;;  %s2329_s7 = smov [#allocation14]  }
 0x162   :  { %s1701_s30 = sshll.u32 %s2329_s7, 4  ;;  %s1702_s30 = int_to_ptr.vmem [resolvable:$true] %s1701_s30 }
 0x163   :  { %s2264_s1 = scalar_lea.vmem %s1702_s30, 128  ;;  %p2269_p3 = scmp.lt.s32.totalorder %s1702_s30, %s1702_s30 }
 0x164   :  { %1511 = vmatpush1.bf16.msra.mxu0 %v1847_v12  ;;  %p2265_p2 = scmp.ne.s32.totalorder %s1702_s30, %s2264_s1  ;;  %p2270_p4 = scmp.lt.s32.totalorder %s2264_s1, %s2264_s1 }
 0x165   :  { %1512 = vmatprep.subr.bf16.mxu0 %v1840_v15 }
 0x166   :  { %p2271_p5 = por %p2270_p4, %p2269_p3 }
 0x168   :  { %1513 = vmatpush1.bf16.msra.mxu0 %v1839_v16  ;;  %v1016_v16 = vld [vmem:[#allocation11 + $0x1b0] sm:$0xff]  ;;  %p2272_p6 = pnand %p2271_p5, %p2265_p2 }
 0x169   :  { %1514 = vmatprep.subr.bf16.mxu0 %v1832_v19  ;;  %v1858_v22 = vcombine.high %v1012_v14, %v1016_v16 }
 0x16c   :  { %1515 = vmatpush1.bf16.msra.mxu0 %v1831_v20 }
 0x16d   :  { %1516 = vmatprep.subr.bf16.mxu0 %v1824_v23  ;;  %v1860_v23 = vcombine.high %v1013_v17, %v1017_v18 }
 0x170   :  { %1517 = vmatpush1.bf16.msra.mxu0 %v1823_v24  ;;  %v1004_v24 = vld [vmem:[#allocation11 + $0x150] sm:$0xff] }
 0x171   :  { %1518 = vmatprep.subr.bf16.mxu0 %v1816_v27  ;;  %v1005_v27 = vld [vmem:[#allocation11 + $0x158] sm:$0xff]  ;;  %v1849_v37 = vcombine.low %v1004_v24, %v1008_v26 }
 0x174   :  { %1519 = vmatpush1.bf16.msra.mxu0 %v1815_v28  ;;  %v1009_v28 = vld [vmem:[#allocation11 + $0x178] sm:$0xff] }
 0x175   :  { %1520 = vmatprep.subr.bf16.mxu0 %v1808_v1  ;;  %v1852_v32 = vcombine.high %v1005_v27, %v1009_v28  ;;  %v1851_v38 = vcombine.low %v1005_v27, %v1009_v28  ;;  %v964_v1 = vld [vmem:[#allocation11 + $0x10] sm:$0xff] }
 0x178   :  { %1521 = vmatpush1.bf16.msra.mxu0 %v1807_v0 }
 0x179   :  { %1588 = vmatprep.subr.bf16.mxu0 %v1868_v9  ;;  %v1809_v9 = vcombine.low %v964_v1, %v968_v2 }
 0x21b   :  { %v936_v51 = vpop.f32.mrf.mxu0 }
 0x21c   :  { %v2437_v52 = vadd.f32 %v1790_v50, %v936_v51  ;;  %v982_v50 = vld [vmem:[#allocation11 + $0xa0] sm:$0xff]  ;;  %v1829_v51 = vcombine.low %v986_v45, %v990_v46 }
 0x21d   :  { %v1997_v53 = vpop.f32.mrf.mxu0 }
 0x21e   :  { %942 = vst [vmem:[#allocation14] sm:$0xff] %v2437_v52  ;;  %v944_v54 = vmul.f32 0.5, %v2437_v52  ;;  %v970_v53 = vld [vmem:[#allocation11 + $0x40] sm:$0xff] }
 0x21f   :  { %v939_v55 = vpop.f32.mrf.mxu0 }
 0x220   :  { %v945_v56 = vmul.f32 1.442695, %v944_v54  ;;  %v974_v54 = vld [vmem:[#allocation11 + $0x60] sm:$0xff]  ;;  %v1821_v55 = vcombine.low %v978_v49, %v982_v50 }
 0x221   :  { %v1998_v58 = vpop.f32.mrf.mxu0  ;;  %v1813_v57 = vcombine.low %v970_v53, %v974_v54 }
 0x222   :  { %2110 = vpow2.f32 %v945_v56  ;;  %v1814_v56 = vcombine.high %v970_v53, %v974_v54  ;;  %v962_v58 = vld [vmem:[#allocation11] sm:$0xff]  ;;  %v1833_v53 = vcombine.low %v988_v41, %v992_v42 }
 0x223   :  { %v1806_v61 = vcombine.high %v962_v58, %v966_v59 }
 0x22f   :  { %v2111_v8 = vpop.eup %2110 }
 0x230   :  { %948 = vrot.lane.b32.xlu0 %v2111_v8, %s2319_s27  ;;  %v1867_v8 = vcombine.low %v1021_v4, %v1025_v6  ;;  %v969_v4 = vld [vmem:[#allocation11 + $0x38] sm:$0xff] }
 0x2a2   :  { %v949_v30 = vpop.permute.xlu0 %948 }
 0x2a3   :  { %v951_v31 = vmul.f32 %v949_v30, %v943_v29  ;;  %v1857_v29 = vcombine.low %v1012_v14, %v1016_v16  ;;  %v1859_v30 = vcombine.low %v1013_v17, %v1017_v18 }
 0x2a5   :  { %v952_v34 = vadd.f32 %v951_v31, %v2437_v52  ;;  %v1822_v52 = vcombine.high %v978_v49, %v982_v50  ;;  %v1850_v31 = vcombine.high %v1004_v24, %v1008_v26  ;;  %v980_v49 = vld [vmem:[#allocation11 + $0x90] sm:$0xff] }
 0x2a6   :  { %v984_v50 = vld [vmem:[#allocation11 + $0xb0] sm:$0xff] }
 0x2a7   :  { %v1027_v35 = vpack.c.bf16 %v952_v34, %v952_v34  ;;  %v1000_v34 = vld [vmem:[#allocation11 + $0x130] sm:$0xff] }
 0x2a8   :  { %v1841_v45 = vcombine.low %v996_v33, %v1000_v34 }
 0x2a9   :  { %2008 = vmatmul.mubr.msk.bf16.vlgmr.msra.gmra.mxu1 %vm1058_vm1, %v1027_v35  ;;  %v997_v35 = vld [vmem:[#allocation11 + $0x118] sm:$0xff] }
 0x2aa   :  { %1466 = vmatpush1.bf16.msra.mxu1 %v1861_v63  ;;  %v1805_v63 = vcombine.low %v962_v58, %v966_v59  ;;  %1497 = vmatprep.mubr.bf16.mxu1 %v2328_v10  ;;  %v976_v58 = vld [vmem:[#allocation11 + $0x70] sm:$0xff]  ;;  %v973_v59 = vld [vmem:[#allocation11 + $0x58] sm:$0xff] }
 0x2ab   :  { %1467 = vmatprep.subr.bf16.mxu1 %v1854_v36  ;;  %v1001_v36 = vld [vmem:[#allocation11 + $0x138] sm:$0xff]  ;;  %v1820_v0 = vcombine.high %v973_v59, %v977_v60  ;;  %v1819_v6 = vcombine.low %v973_v59, %v977_v60 }
 0x2ac   :  { %v1843_v46 = vcombine.low %v997_v35, %v1001_v36 }
 0x2ae   :  { %1468 = vmatpush1.bf16.msra.mxu1 %v1853_v39  ;;  %v1842_v39 = vcombine.high %v996_v33, %v1000_v34 }
 0x2af   :  { %1469 = vmatprep.subr.bf16.mxu1 %v1846_v40  ;;  %v1844_v40 = vcombine.high %v997_v35, %v1001_v36 }
 0x2b2   :  { %1470 = vmatpush1.bf16.msra.mxu1 %v1845_v43  ;;  %v989_v43 = vld [vmem:[#allocation11 + $0xd8] sm:$0xff] }
 0x2b3   :  { %1471 = vmatprep.subr.bf16.mxu1 %v1838_v44  ;;  %v993_v44 = vld [vmem:[#allocation11 + $0xf8] sm:$0xff] }
 0x2b4   :  { %v1835_v54 = vcombine.low %v989_v43, %v993_v44 }
 0x2b6   :  { %1472 = vmatpush1.bf16.msra.mxu1 %v1837_v47  ;;  %v1834_v47 = vcombine.high %v988_v41, %v992_v42 }
 0x2b7   :  { %1473 = vmatprep.subr.bf16.mxu1 %v1830_v48  ;;  %v1836_v48 = vcombine.high %v989_v43, %v993_v44 }
 0x2ba   :  { %1474 = vmatpush1.bf16.msra.mxu1 %v1829_v51  ;;  %v981_v51 = vld [vmem:[#allocation11 + $0x98] sm:$0xff] }
 0x2bb   :  { %1475 = vmatprep.subr.bf16.mxu1 %v1822_v52  ;;  %v985_v52 = vld [vmem:[#allocation11 + $0xb8] sm:$0xff] }
 0x2bc   :  { %v1827_v62 = vcombine.low %v981_v51, %v985_v52 }
 0x2be   :  { %1476 = vmatpush1.bf16.msra.mxu1 %v1821_v55  ;;  %v1826_v55 = vcombine.high %v980_v49, %v984_v50 }
 0x2bf   :  { %1477 = vmatprep.subr.bf16.mxu1 %v1814_v56  ;;  %v1828_v56 = vcombine.high %v981_v51, %v985_v52 }
 0x2c2   :  { %1478 = vmatpush1.bf16.msra.mxu1 %v1813_v57  ;;  %v972_v57 = vld [vmem:[#allocation11 + $0x50] sm:$0xff] }
 0x2c3   :  { %1479 = vmatprep.subr.bf16.mxu1 %v1806_v61  ;;  %v1825_v61 = vcombine.low %v980_v49, %v984_v50 }
 0x2c6   :  { %1480 = vmatpush1.bf16.msra.mxu1 %v1805_v63  ;;  %v1818_v63 = vcombine.high %v972_v57, %v976_v58 }
 0x2c7   :  { %1547 = vmatprep.subr.bf16.mxu1 %v1866_v5  ;;  %v1817_v5 = vcombine.low %v972_v57, %v976_v58 }
 0x369   :  { %v1096_v12 = vpop.f32.mrf.mxu1 }
 0x36a   :  { %v1097_v13 = vadd.f32 %v1799_v11, %v1096_v12 }
 0x36b   :  { %v2009_v15 = vpop.f32.mrf.mxu1 }
 0x36c   :  { %v1102_v19 = vmax.f32 %v1097_v13, 0.0 }
 0x36d   :  { %v1099_v20 = vpop.f32.mrf.mxu1 }
 0x36e   :  { %v2447_v21 = vpack.c.bf16 %v1102_v19, %v1102_v19 }
 0x36f   :  { %v2010_v25 = vpop.f32.mrf.mxu1 }
 0x370   :  { %1498 = vmatmul.mubr.bf16.vlgmr.msra.gmra.mxu1 %v2447_v21  ;;  %1539 = vmatmul.mubr.bf16.vlgmr.msra.gmra.mxu0 %v2447_v21 }
 0x371   :  { %1548 = vmatpush1.bf16.msra.mxu1 %v1865_v7  ;;  %1589 = vmatpush1.bf16.msra.mxu0 %v1867_v8  ;;  %v1810_v7 = vcombine.high %v964_v1, %v968_v2  ;;  %v1812_v8 = vcombine.high %v965_v3, %v969_v4 }
 0x372   :  { %1549 = vmatprep.subr.bf16.mxu1 %v1858_v22  ;;  %1590 = vmatprep.subr.bf16.mxu0 %v1860_v23 }
 0x373   :  { %1579 = vmatprep.mubr.bf16.mxu1 %v2328_v10  ;;  %1620 = vmatprep.mubr.bf16.mxu0 %v2328_v10  ;;  %v1811_v10 = vcombine.low %v965_v3, %v969_v4 }
 0x375   :  { %1550 = vmatpush1.bf16.msra.mxu1 %v1857_v29  ;;  %1591 = vmatpush1.bf16.msra.mxu0 %v1859_v30 }
 0x376   :  { %1551 = vmatprep.subr.bf16.mxu1 %v1850_v31  ;;  %1592 = vmatprep.subr.bf16.mxu0 %v1852_v32 }
 0x379   :  { %1552 = vmatpush1.bf16.msra.mxu1 %v1849_v37  ;;  %1593 = vmatpush1.bf16.msra.mxu0 %v1851_v38 }
 0x37a   :  { %1553 = vmatprep.subr.bf16.mxu1 %v1842_v39  ;;  %1594 = vmatprep.subr.bf16.mxu0 %v1844_v40 }
 0x37d   :  { %1554 = vmatpush1.bf16.msra.mxu1 %v1841_v45  ;;  %1595 = vmatpush1.bf16.msra.mxu0 %v1843_v46 }
 0x37e   :  { %1555 = vmatprep.subr.bf16.mxu1 %v1834_v47  ;;  %1596 = vmatprep.subr.bf16.mxu0 %v1836_v48 }
 0x381   :  { %1556 = vmatpush1.bf16.msra.mxu1 %v1833_v53  ;;  %1597 = vmatpush1.bf16.msra.mxu0 %v1835_v54 }
 0x382   :  { %1557 = vmatprep.subr.bf16.mxu1 %v1826_v55  ;;  %1598 = vmatprep.subr.bf16.mxu0 %v1828_v56 }
 0x385   :  { %1558 = vmatpush1.bf16.msra.mxu1 %v1825_v61  ;;  %1599 = vmatpush1.bf16.msra.mxu0 %v1827_v62 }
 0x386   :  { %1559 = vmatprep.subr.bf16.mxu1 %v1818_v63  ;;  %1600 = vmatprep.subr.bf16.mxu0 %v1820_v0 }
 0x389   :  { %1560 = vmatpush1.bf16.msra.mxu1 %v1817_v5  ;;  %1601 = vmatpush1.bf16.msra.mxu0 %v1819_v6 }
 0x38a   :  { %1561 = vmatprep.subr.bf16.mxu1 %v1810_v7  ;;  %1602 = vmatprep.subr.bf16.mxu0 %v1812_v8 }
 0x38d   :  { %1562 = vmatpush1.bf16.msra.mxu1 %v1809_v9  ;;  %1603 = vmatpush1.bf16.msra.mxu0 %v1811_v10 }
 0x390   :  { %1580 = vmatmul.mubr.bf16.vlgmr.msra.gmra.mxu1 %v2447_v21  ;;  %1621 = vmatmul.mubr.bf16.vlgmr.msra.gmra.mxu0 %v2447_v21 }
 0x391   :  { %2275 = shalt.err (!%p2272_p6)
}
 0x392   :  { %1704 = dma.vmem_to_hbm [thread:$0]  %s1702_s30, 128, %s2473_s11, [#allocation15]   ;;  %v1105_v11 = vlaneseq  ;;  %v1026_v15 = vld [vmem:[%s2471_s9] sm:$0xff] }
 0x393   :  { %s2330_s9 = smov [#allocation13]  }
 0x394   :  { %v1106_v12 = vshrl.u32 %v1105_v11, 7  ;;  %s1691_s11 = sshll.u32 %s2330_s9, 4  ;;  %s1692_s11 = int_to_ptr.vmem [resolvable:$true] %s1691_s11 }
 0x395   :  { %s2284_s16 = scalar_lea.vmem %s1692_s11, 1024  ;;  %p2289_p8 = scmp.lt.s32.totalorder %s1692_s11, %s1692_s11 }
 0x396   :  { %v1107_v13 = vsub.s32 0, %v1106_v12  ;;  %v1115_v14 = vsub.s32 2, %v1106_v12  ;;  %v1111_v16 = vsub.s32 1, %v1106_v12  ;;  %v1119_v17 = vsub.s32 3, %v1106_v12  ;;  %p2285_p7 = scmp.ne.s32.totalorder %s1692_s11, %s2284_s16  ;;  %p2290_p9 = scmp.lt.s32.totalorder %s2284_s16, %s2284_s16 }
 0x397   :  { %v1123_v46 = vsub.s32 4, %v1106_v12  ;;  %v1131_v47 = vsub.s32 6, %v1106_v12  ;;  %v1127_v48 = vsub.s32 5, %v1106_v12  ;;  %v1135_v49 = vsub.s32 7, %v1106_v12 }
 0x398   :  { %v1108_v18 = vrot.slane %v1026_v15, %v1107_v13  ;;  %v1116_v19 = vrot.slane %v1026_v15, %v1115_v14  ;;  %v1112_v20 = vrot.slane %v1026_v15, %v1111_v16  ;;  %v1120_v21 = vrot.slane %v1026_v15, %v1119_v17  ;;  %p2291_p10 = por %p2290_p9, %p2289_p8 }
 0x399   :  { %v1124_v50 = vrot.slane %v1026_v15, %v1123_v46  ;;  %v1132_v51 = vrot.slane %v1026_v15, %v1131_v47  ;;  %v1128_v52 = vrot.slane %v1026_v15, %v1127_v48  ;;  %v1136_v53 = vrot.slane %v1026_v15, %v1135_v49 }
 0x39a   :  { %p2292_p11 = pnand %p2291_p10, %p2285_p7 }
 0x430   :  { %v1499_v22 = vpop.f32.mrf.mxu1  ;;  %v1540_v23 = vpop.f32.mrf.mxu0 }
 0x431   :  { %v1500_v24 = vadd.f32 %v1499_v22, %v1108_v18  ;;  %v1541_v25 = vadd.f32 %v1540_v23, %v1116_v19 }
 0x432   :  { %v1501_v26 = vpop.f32.mrf.mxu1  ;;  %v1542_v27 = vpop.f32.mrf.mxu0 }
 0x433   :  { %v1869_v28 = vmul.f32 -1.442695, %v1500_v24  ;;  %v1871_v29 = vmul.f32 -1.442695, %v1541_v25  ;;  %v1502_v30 = vadd.f32 %v1501_v26, %v1112_v20  ;;  %v1543_v31 = vadd.f32 %v1542_v27, %v1120_v21 }
 0x434   :  { %v1503_v32 = vpop.f32.mrf.mxu1  ;;  %v1544_v33 = vpop.f32.mrf.mxu0 }
 0x435   :  { %2112 = vpow2.f32 %v1869_v28  ;;  %v1870_v34 = vmul.f32 -1.442695, %v1502_v30  ;;  %v1872_v35 = vmul.f32 -1.442695, %v1543_v31 }
 0x436   :  { %2114 = vpow2.f32 %v1871_v29  ;;  %v1504_v36 = vpop.f32.mrf.mxu1  ;;  %v1545_v37 = vpop.f32.mrf.mxu0 }
 0x437   :  { %2116 = vpow2.f32 %v1870_v34 }
 0x438   :  { %2118 = vpow2.f32 %v1872_v35 }
 0x442   :  { %v2113_v38 = vpop.eup %2112 }
 0x443   :  { %v2115_v39 = vpop.eup %2114  ;;  %v1653_v40 = vadd.f32 1.0, %v2113_v38 }
 0x444   :  { %v2117_v41 = vpop.eup %2116  ;;  %v1655_v42 = vadd.f32 1.0, %v2115_v39 }
 0x445   :  { %v2119_v43 = vpop.eup %2118  ;;  %2120 = vrcp.f32 %v1653_v40  ;;  %v1654_v44 = vadd.f32 1.0, %v2117_v41 }
 0x446   :  { %2122 = vrcp.f32 %v1655_v42  ;;  %v1656_v45 = vadd.f32 1.0, %v2119_v43 }
 0x447   :  { %2124 = vrcp.f32 %v1654_v44 }
 0x448   :  { %2126 = vrcp.f32 %v1656_v45 }
 0x450   :  { %v1581_v54 = vpop.f32.mrf.mxu1  ;;  %v1622_v55 = vpop.f32.mrf.mxu0 }
 0x451   :  { %v1582_v56 = vadd.f32 %v1581_v54, %v1124_v50  ;;  %v1623_v57 = vadd.f32 %v1622_v55, %v1132_v51 }
 0x452   :  { %v2121_v58 = vpop.eup %2120  ;;  %v1583_v59 = vpop.f32.mrf.mxu1 }
 0x453   :  { %v1624_v60 = vpop.f32.mrf.mxu0  ;;  %v2123_v61 = vpop.eup %2122  ;;  %1677 = vst [vmem:[#allocation13] sm:$0xff] %v2121_v58  ;;  %v1873_v62 = vmul.f32 -1.442695, %v1582_v56  ;;  %v1875_v63 = vmul.f32 -1.442695, %v1623_v57  ;;  %v1584_v0 = vadd.f32 %v1583_v59, %v1128_v52 }
 0x454   :  { %v1625_v1 = vadd.f32 %v1624_v60, %v1136_v53  ;;  %v2125_v2 = vpop.eup %2124  ;;  %1679 = vst [vmem:[#allocation13 + $0x10] sm:$0xff] %v2123_v61  ;;  %v1585_v3 = vpop.f32.mrf.mxu1 }
 0x455   :  { %v1626_v4 = vpop.f32.mrf.mxu0  ;;  %v2127_v5 = vpop.eup %2126  ;;  %1678 = vst [vmem:[#allocation13 + $0x8] sm:$0xff] %v2125_v2  ;;  %2128 = vpow2.f32 %v1873_v62  ;;  %v1874_v6 = vmul.f32 -1.442695, %v1584_v0 }
 0x456   :  { %v1876_v7 = vmul.f32 -1.442695, %v1625_v1  ;;  %1680 = vst [vmem:[#allocation13 + $0x18] sm:$0xff] %v2127_v5  ;;  %2130 = vpow2.f32 %v1875_v63  ;;  %v1586_v8 = vpop.f32.mrf.mxu1 }
 0x457   :  { %v1627_v9 = vpop.f32.mrf.mxu0  ;;  %2132 = vpow2.f32 %v1874_v6 }
 0x458   :  { %2134 = vpow2.f32 %v1876_v7 }
 0x462   :  { %v2129_v10 = vpop.eup %2128 }
 0x463   :  { %v2131_v11 = vpop.eup %2130  ;;  %v1657_v12 = vadd.f32 1.0, %v2129_v10 }
 0x464   :  { %v2133_v13 = vpop.eup %2132  ;;  %v1659_v14 = vadd.f32 1.0, %v2131_v11 }
 0x465   :  { %v2135_v15 = vpop.eup %2134  ;;  %2136 = vrcp.f32 %v1657_v12  ;;  %v1658_v16 = vadd.f32 1.0, %v2133_v13 }
 0x466   :  { %2138 = vrcp.f32 %v1659_v14  ;;  %v1660_v17 = vadd.f32 1.0, %v2135_v15 }
 0x467   :  { %2140 = vrcp.f32 %v1658_v16 }
 0x468   :  { %2142 = vrcp.f32 %v1660_v17 }
 0x472   :  { %v2137_v18 = vpop.eup %2136 }
 0x473   :  { %v2139_v19 = vpop.eup %2138  ;;  %1681 = vst [vmem:[#allocation13 + $0x20] sm:$0xff] %v2137_v18 }
 0x474   :  { %v2141_v20 = vpop.eup %2140  ;;  %1683 = vst [vmem:[#allocation13 + $0x30] sm:$0xff] %v2139_v19 }
 0x475   :  { %v2143_v21 = vpop.eup %2142  ;;  %1682 = vst [vmem:[#allocation13 + $0x28] sm:$0xff] %v2141_v20 }
 0x476   :  { %1684 = vst [vmem:[#allocation13 + $0x38] sm:$0xff] %v2143_v21 }
 0x477   :  { %2295 = shalt.err (!%p2292_p11)
}
 0x478   :  { %1694 = dma.vmem_to_hbm [thread:$0]  %s1692_s11, 1024, %s2472_s10, [#allocation4]  }
 0x479   :  { %2312 = dma.done.wait [#allocation4], 1024  }
 0x47a   :  { %2313 = vsyncadd [#allocation4], 4294966272 }
 0x47b   :  { %2314 = dma.done.wait [#allocation15], 128  }
 0x47c   :  { %2315 = vsyncadd [#allocation15], 4294967168 }
 0x47d   :  { %1711 = vsyncpa [#allocation3], 1 }
 0x47e   :  { %1712 = vsyncpa [#allocation6], 1 }
 0x47f   :  { %1713 = vsyncpa [#allocation9], 1 }
 0x480   :  { %1714 = vsyncpa [#allocation12], 1 }
 0x481   :  { %1715 = vsyncpa [#allocation4], 1 }
 0x482   :  { %1716 = vsyncpa [#allocation15], 1 }

</bundles_post_ra>
